<compile_context>
chip_gen: v7x
topology: tpu7x:2x2x1
jax: 0.10.0
libtpu: 0.0.40
codegen_flags: <defaults>
</compile_context>

<pallas_src>
import jax
import jax.numpy as jnp
from jax.experimental import pallas as pl
from jax.experimental.pallas import tpu as pltpu

LANE = 128          # lane width: hidden dims are zero-padded to a multiple of this
SUBLANE_BF16 = 16   # bf16 packs 16 rows per vreg -> batch-tile alignment


def _round_up(n, m):
    return ((n + m - 1) // m) * m


def _mlp_kernel(x_ref,
                w1_ref, b1_ref,
                w2_ref, b2_ref,
                w3_ref, b3_ref,
                w4_ref, b4_ref,
                o_ref):
    """relu(relu(relu(x@W1+b1)@W2+b2)@W3+b3)@W4+b4 for one batch tile.

    x arrives f32 at its logical feature width; it is cast to bf16 here so all
    matmuls use bf16 operands on the MXU with f32 accumulation.  Hidden lane
    dims are pre-padded to 128 (zeros), the final layer keeps the logical
    output width so the HBM writeback is minimal.
    """
    h = x_ref[...].astype(jnp.bfloat16)

    h = jnp.dot(h, w1_ref[...], preferred_element_type=jnp.float32) + b1_ref[...]
    h = jnp.maximum(h, 0.0).astype(jnp.bfloat16)

    h = jnp.dot(h, w2_ref[...], preferred_element_type=jnp.float32) + b2_ref[...]
    h = jnp.maximum(h, 0.0).astype(jnp.bfloat16)

    h = jnp.dot(h, w3_ref[...], preferred_element_type=jnp.float32) + b3_ref[...]
    h = jnp.maximum(h, 0.0).astype(jnp.bfloat16)

    y = jnp.dot(h, w4_ref[...], preferred_element_type=jnp.float32) + b4_ref[...]
    o_ref[...] = y.astype(o_ref.dtype)


def prepare_params(params):
    """Pad + cast the logical f32 params once (hoisted out of the forward path).

    Hidden widths -> next multiple of 128 with zeros (inert under ReLU);
    the first layer keeps K = n_feature, the last layer keeps N = n_output.
    Weights -> bf16 (MXU operands); biases stay f32 (added after accumulation).
    """
    def pad_to(a, rows, cols, dtype):
        r, c = a.shape
        return jnp.pad(a, ((0, rows - r), (0, cols - c))).astype(dtype)

    n_feature = params["w1"].shape[0]
    h1 = _round_up(params["w1"].shape[1], LANE)
    h2 = _round_up(params["w2"].shape[1], LANE)
    h3 = _round_up(params["w3"].shape[1], LANE)
    n_output = params["w4"].shape[1]

    return {
        "w1": pad_to(params["w1"], n_feature, h1, jnp.bfloat16),
        "b1": pad_to(params["b1"].reshape(1, -1), 1, h1, jnp.float32),
        "w2": pad_to(params["w2"], h1, h2, jnp.bfloat16),
        "b2": pad_to(params["b2"].reshape(1, -1), 1, h2, jnp.float32),
        "w3": pad_to(params["w3"], h2, h3, jnp.bfloat16),
        "b3": pad_to(params["b3"].reshape(1, -1), 1, h3, jnp.float32),
        "w4": pad_to(params["w4"], h3, n_output, jnp.bfloat16),
        "b4": params["b4"].reshape(1, -1).astype(jnp.float32),
    }


def net2_forward(x, prepared, *, tile_b=None):
    """Fused Net2 forward pass via a single Pallas kernel.

    x: [B, n_feature] float32 (unpadded).
    prepared: output of prepare_params().
    Returns [B, n_output] float32.
    """
    B, F = x.shape
    assert prepared["w1"].shape[0] == F, "feature dim mismatch with prepared params"
    n_output = prepared["w4"].shape[1]

    # Batch-tile heuristic (16-row aligned for bf16 sublane packing):
    #   * B <= 1024 : one grid step (best on 1-TC v5e/v6e; a v7x split at these
    #     sizes doesn't pay for its per-step overhead).
    #   * B  > 1024 : >=2 steps of 512..1024 rows (both v7x TCs busy, near the
    #     measured HBM roofline on all generations).
    B_al = _round_up(B, SUBLANE_BF16)
    if tile_b is None:
        if B_al <= 1024:
            tile_b = B_al
        else:
            tile_b = min(1024, _round_up(pl.cdiv(B_al, 2), SUBLANE_BF16))
    tile_b = _round_up(tile_b, SUBLANE_BF16)
    B_pad = _round_up(B, tile_b)

    # x stays f32 / unpadded on the feature axis; only pad batch rows if needed.
    x_in = x if B_pad == B else jnp.pad(x, ((0, B_pad - B), (0, 0)))

    grid = (B_pad // tile_b,)

    def full_spec(arr):
        # Grid-invariant full block (weights / biases).
        # TODO(synk): pipeline_mode=pl.Buffered(1) would single-buffer these
        # (~0.13 MiB VMEM saved); negligible at these sizes, so left default.
        return pl.BlockSpec(arr.shape, lambda i: (0, 0))

    in_specs = [
        pl.BlockSpec((tile_b, F), lambda i: (i, 0)),   # x: logical feature width
        full_spec(prepared["w1"]), full_spec(prepared["b1"]),
        full_spec(prepared["w2"]), full_spec(prepared["b2"]),
        full_spec(prepared["w3"]), full_spec(prepared["b3"]),
        full_spec(prepared["w4"]), full_spec(prepared["b4"]),
    ]
    out_spec = pl.BlockSpec((tile_b, n_output), lambda i: (i, 0))

    out = pl.pallas_call(
        _mlp_kernel,
        out_shape=jax.ShapeDtypeStruct((B_pad, n_output), jnp.float32),
        grid_spec=pltpu.PrefetchScalarGridSpec(
            num_scalar_prefetch=0,
            grid=grid,
            in_specs=in_specs,
            out_specs=out_spec,
        ),
        compiler_params=pltpu.CompilerParams(
            dimension_semantics=("parallel",),
        ),
    )(x_in, prepared["w1"], prepared["b1"], prepared["w2"], prepared["b2"],
      prepared["w3"], prepared["b3"], prepared["w4"], prepared["b4"])

    return out if B_pad == B else out[:B]


def init_params(key, n_feature, n_hidden, n_output):
    """Deterministic PyTorch-style (uniform +/- 1/sqrt(fan_in)) init, f32, logical shapes."""
    dims = [(n_feature, n_hidden), (n_hidden, 100), (100, 10), (10, n_output)]
    params = {}
    for idx, (fan_in, fan_out) in enumerate(dims, start=1):
        key, kw, kb = jax.random.split(key, 3)
        bound = 1.0 / jnp.sqrt(jnp.float32(fan_in))
        params[f"w{idx}"] = jax.random.uniform(
            kw, (fan_in, fan_out), jnp.float32, -bound, bound)
        params[f"b{idx}"] = jax.random.uniform(
            kb, (1, fan_out), jnp.float32, -bound, bound)
    return params


def net2_reference_f32(x, p):
    h = jnp.maximum(x @ p["w1"] + p["b1"], 0.0)
    h = jnp.maximum(h @ p["w2"] + p["b2"], 0.0)
    h = jnp.maximum(h @ p["w3"] + p["b3"], 0.0)
    return h @ p["w4"] + p["b4"]


def net2_reference_bf16(x, p):
    """Reference matching the kernel's bf16-operand / f32-accumulate numerics."""
    def mm(a, w):
        return jnp.dot(a.astype(jnp.bfloat16), w.astype(jnp.bfloat16),
                       preferred_element_type=jnp.float32)
    h = jnp.maximum(mm(x, p["w1"]) + p["b1"], 0.0)
    h = jnp.maximum(mm(h, p["w2"]) + p["b2"], 0.0)
    h = jnp.maximum(mm(h, p["w3"]) + p["b3"], 0.0)
    return mm(h, p["w4"]) + p["b4"]


if __name__ == "__main__":
    n_feature, n_hidden, n_output = 32, 64, 4
    batch = 32

    key = jax.random.PRNGKey(0)
    key, kx = jax.random.split(key)
    x = jax.random.normal(kx, (batch, n_feature), jnp.float32)
    params = init_params(key, n_feature, n_hidden, n_output)

    prepared = prepare_params(params)          # pad + bf16-cast once, reused per call
    out = net2_forward(x, prepared)
    out = jax.block_until_ready(out)
    assert out.shape == (batch, n_output)

    ref_bf16 = net2_reference_bf16(x, params)
    ref_f32 = net2_reference_f32(x, params)
    # Tight check vs a reference with matching bf16-operand numerics,
    # loose check vs the pure-f32 PyTorch-equivalent reference.
    assert jnp.allclose(out, ref_bf16, atol=1e-3, rtol=1e-3), "mismatch vs bf16 reference"
    assert jnp.allclose(out, ref_f32, atol=5e-2, rtol=5e-2), "mismatch vs f32 reference"

    print("KERNEL_OK")
</pallas_src>

<mosaic_0001>
module attributes {stable_mosaic.version = 11 : i64} {
  func.func @_mlp_kernel(%arg0: i32, %arg1: memref<32x32xf32, #tpu.memory_space<vmem>>, %arg2: memref<32x128xbf16, #tpu.memory_space<vmem>>, %arg3: memref<1x128xf32, #tpu.memory_space<vmem>>, %arg4: memref<128x128xbf16, #tpu.memory_space<vmem>>, %arg5: memref<1x128xf32, #tpu.memory_space<vmem>>, %arg6: memref<128x128xbf16, #tpu.memory_space<vmem>>, %arg7: memref<1x128xf32, #tpu.memory_space<vmem>>, %arg8: memref<128x4xbf16, #tpu.memory_space<vmem>>, %arg9: memref<1x4xf32, #tpu.memory_space<vmem>>, %arg10: memref<32x4xf32, #tpu.memory_space<vmem>>) attributes {dimension_semantics = [#tpu.dimension_semantics<parallel>], iteration_bounds = array<i64: 1>, scalar_prefetch = 0 : i64, scratch_operands = 0 : i64, tpu.core_type = #tpu.core_type<tc>, window_params = [{transform_indices = @transform_0, window_bounds = array<i64: 32, 32>}, {pipeline_mode = #tpu.pipeline_mode<synchronous>, transform_indices = @transform_1, window_bounds = array<i64: 32, 128>}, {pipeline_mode = #tpu.pipeline_mode<synchronous>, transform_indices = @transform_2, window_bounds = array<i64: 1, 128>}, {pipeline_mode = #tpu.pipeline_mode<synchronous>, transform_indices = @transform_3, window_bounds = array<i64: 128, 128>}, {pipeline_mode = #tpu.pipeline_mode<synchronous>, transform_indices = @transform_4, window_bounds = array<i64: 1, 128>}, {pipeline_mode = #tpu.pipeline_mode<synchronous>, transform_indices = @transform_5, window_bounds = array<i64: 128, 128>}, {pipeline_mode = #tpu.pipeline_mode<synchronous>, transform_indices = @transform_6, window_bounds = array<i64: 1, 128>}, {pipeline_mode = #tpu.pipeline_mode<synchronous>, transform_indices = @transform_7, window_bounds = array<i64: 128, 4>}, {pipeline_mode = #tpu.pipeline_mode<synchronous>, transform_indices = @transform_8, window_bounds = array<i64: 1, 4>}, {transform_indices = @transform_9, window_bounds = array<i64: 32, 4>}]} {
    %c0 = arith.constant 0 : index
    %c0_0 = arith.constant 0 : index
    %0 = vector.load %arg1[%c0, %c0_0] : memref<32x32xf32, #tpu.memory_space<vmem>>, vector<32x32xf32>
    %1 = arith.truncf %0 : vector<32x32xf32> to vector<32x32xbf16>
    %c0_1 = arith.constant 0 : index
    %c0_2 = arith.constant 0 : index
    %2 = vector.load %arg2[%c0_1, %c0_2] : memref<32x128xbf16, #tpu.memory_space<vmem>>, vector<32x128xbf16>
    %cst = arith.constant dense<0.000000e+00> : vector<32x128xf32>
    %3 = tpu.matmul %1, %2, %cst {dimension_numbers = #tpu.dot_dimension_numbers<[1], [0], [0], [1], [0, 0, 1, 1], [], []>} : vector<32x32xbf16>, vector<32x128xbf16>, vector<32x128xf32> -> vector<32x128xf32>
    %c0_3 = arith.constant 0 : index
    %c0_4 = arith.constant 0 : index
    %4 = vector.load %arg3[%c0_3, %c0_4] : memref<1x128xf32, #tpu.memory_space<vmem>>, vector<1x128xf32>
    %5 = vector.broadcast %4 : vector<1x128xf32> to vector<32x128xf32>
    %6 = arith.addf %3, %5 : vector<32x128xf32>
    %cst_5 = arith.constant 0.000000e+00 : f32
    %7 = vector.broadcast %cst_5 : f32 to vector<32x128xf32>
    %8 = arith.maximumf %6, %7 : vector<32x128xf32>
    %9 = arith.truncf %8 : vector<32x128xf32> to vector<32x128xbf16>
    %c0_6 = arith.constant 0 : index
    %c0_7 = arith.constant 0 : index
    %10 = vector.load %arg4[%c0_6, %c0_7] : memref<128x128xbf16, #tpu.memory_space<vmem>>, vector<128x128xbf16>
    %cst_8 = arith.constant dense<0.000000e+00> : vector<32x128xf32>
    %11 = tpu.matmul %9, %10, %cst_8 {dimension_numbers = #tpu.dot_dimension_numbers<[1], [0], [0], [1], [0, 0, 1, 1], [], []>} : vector<32x128xbf16>, vector<128x128xbf16>, vector<32x128xf32> -> vector<32x128xf32>
    %c0_9 = arith.constant 0 : index
    %c0_10 = arith.constant 0 : index
    %12 = vector.load %arg5[%c0_9, %c0_10] : memref<1x128xf32, #tpu.memory_space<vmem>>, vector<1x128xf32>
    %13 = vector.broadcast %12 : vector<1x128xf32> to vector<32x128xf32>
    %14 = arith.addf %11, %13 : vector<32x128xf32>
    %cst_11 = arith.constant 0.000000e+00 : f32
    %15 = vector.broadcast %cst_11 : f32 to vector<32x128xf32>
    %16 = arith.maximumf %14, %15 : vector<32x128xf32>
    %17 = arith.truncf %16 : vector<32x128xf32> to vector<32x128xbf16>
    %c0_12 = arith.constant 0 : index
    %c0_13 = arith.constant 0 : index
    %18 = vector.load %arg6[%c0_12, %c0_13] : memref<128x128xbf16, #tpu.memory_space<vmem>>, vector<128x128xbf16>
    %cst_14 = arith.constant dense<0.000000e+00> : vector<32x128xf32>
    %19 = tpu.matmul %17, %18, %cst_14 {dimension_numbers = #tpu.dot_dimension_numbers<[1], [0], [0], [1], [0, 0, 1, 1], [], []>} : vector<32x128xbf16>, vector<128x128xbf16>, vector<32x128xf32> -> vector<32x128xf32>
    %c0_15 = arith.constant 0 : index
    %c0_16 = arith.constant 0 : index
    %20 = vector.load %arg7[%c0_15, %c0_16] : memref<1x128xf32, #tpu.memory_space<vmem>>, vector<1x128xf32>
    %21 = vector.broadcast %20 : vector<1x128xf32> to vector<32x128xf32>
    %22 = arith.addf %19, %21 : vector<32x128xf32>
    %cst_17 = arith.constant 0.000000e+00 : f32
    %23 = vector.broadcast %cst_17 : f32 to vector<32x128xf32>
    %24 = arith.maximumf %22, %23 : vector<32x128xf32>
    %25 = arith.truncf %24 : vector<32x128xf32> to vector<32x128xbf16>
    %c0_18 = arith.constant 0 : index
    %c0_19 = arith.constant 0 : index
    %26 = vector.load %arg8[%c0_18, %c0_19] : memref<128x4xbf16, #tpu.memory_space<vmem>>, vector<128x4xbf16>
    %cst_20 = arith.constant dense<0.000000e+00> : vector<32x4xf32>
    %27 = tpu.matmul %25, %26, %cst_20 {dimension_numbers = #tpu.dot_dimension_numbers<[1], [0], [0], [1], [0, 0, 1, 1], [], []>} : vector<32x128xbf16>, vector<128x4xbf16>, vector<32x4xf32> -> vector<32x4xf32>
    %c0_21 = arith.constant 0 : index
    %c0_22 = arith.constant 0 : index
    %28 = vector.load %arg9[%c0_21, %c0_22] : memref<1x4xf32, #tpu.memory_space<vmem>>, vector<1x4xf32>
    %29 = vector.broadcast %28 : vector<1x4xf32> to vector<32x4xf32>
    %30 = arith.addf %27, %29 : vector<32x4xf32>
    %c0_23 = arith.constant 0 : index
    %c0_24 = arith.constant 0 : index
    %31 = vector.load %arg10[%c0_23, %c0_24] : memref<32x4xf32, #tpu.memory_space<vmem>>, vector<32x4xf32>
    tpu.vector_store %arg10[%c0_23, %c0_24], %30 {strides = array<i32>} : memref<32x4xf32, #tpu.memory_space<vmem>>, vector<32x4xf32>,
    return
  }
  func.func @transform_0(%arg0: i32) -> (i32, i32) {
    %c0_i32 = arith.constant 0 : i32
    %c0_i32_0 = arith.constant 0 : i32
    return %arg0, %c0_i32 : i32, i32
  }
  func.func @transform_1(%arg0: i32) -> (i32, i32) {
    %c0_i32 = arith.constant 0 : i32
    %c0_i32_0 = arith.constant 0 : i32
    %c0_i32_1 = arith.constant 0 : i32
    return %c0_i32, %c0_i32_0 : i32, i32
  }
  func.func @transform_2(%arg0: i32) -> (i32, i32) {
    %c0_i32 = arith.constant 0 : i32
    %c0_i32_0 = arith.constant 0 : i32
    %c0_i32_1 = arith.constant 0 : i32
    return %c0_i32, %c0_i32_0 : i32, i32
  }
  func.func @transform_3(%arg0: i32) -> (i32, i32) {
    %c0_i32 = arith.constant 0 : i32
    %c0_i32_0 = arith.constant 0 : i32
    %c0_i32_1 = arith.constant 0 : i32
    return %c0_i32, %c0_i32_0 : i32, i32
  }
  func.func @transform_4(%arg0: i32) -> (i32, i32) {
    %c0_i32 = arith.constant 0 : i32
    %c0_i32_0 = arith.constant 0 : i32
    %c0_i32_1 = arith.constant 0 : i32
    return %c0_i32, %c0_i32_0 : i32, i32
  }
  func.func @transform_5(%arg0: i32) -> (i32, i32) {
    %c0_i32 = arith.constant 0 : i32
    %c0_i32_0 = arith.constant 0 : i32
    %c0_i32_1 = arith.constant 0 : i32
    return %c0_i32, %c0_i32_0 : i32, i32
  }
  func.func @transform_6(%arg0: i32) -> (i32, i32) {
    %c0_i32 = arith.constant 0 : i32
    %c0_i32_0 = arith.constant 0 : i32
    %c0_i32_1 = arith.constant 0 : i32
    return %c0_i32, %c0_i32_0 : i32, i32
  }
  func.func @transform_7(%arg0: i32) -> (i32, i32) {
    %c0_i32 = arith.constant 0 : i32
    %c0_i32_0 = arith.constant 0 : i32
    %c0_i32_1 = arith.constant 0 : i32
    return %c0_i32, %c0_i32_0 : i32, i32
  }
  func.func @transform_8(%arg0: i32) -> (i32, i32) {
    %c0_i32 = arith.constant 0 : i32
    %c0_i32_0 = arith.constant 0 : i32
    %c0_i32_1 = arith.constant 0 : i32
    return %c0_i32, %c0_i32_0 : i32, i32
  }
  func.func @transform_9(%arg0: i32) -> (i32, i32) {
    %c0_i32 = arith.constant 0 : i32
    %c0_i32_0 = arith.constant 0 : i32
    return %arg0, %c0_i32 : i32, i32
  }
}

</mosaic_0001>

<bundles_post_ra>
// kernel: tpu_custom_call.1
= control target key start
LH: loop header
LB: loop body
LE: loop exit
PB: predicated region body
PF: predicated region fallthrough
CT: control target
= control target key end

     0   :  { %14 = vsyncpa [#allocation3], 0  ;;  %s956_s0 = inlined_call_operand.hbm [shape: f32[32,32], index: 0, kind: input, shape index: {}]   ;;  %s957_s1 = inlined_call_operand.hbm [shape: bf16[32,128], index: 1, kind: input, shape index: {}]   ;;  %s958_s2 = inlined_call_operand.vmem [shape: f32[1,128], index: 2, kind: input, shape index: {}]   ;;  %s959_s3 = inlined_call_operand.vmem [shape: bf16[128,128], index: 3, kind: input, shape index: {}]   ;;  %s960_s4 = inlined_call_operand.vmem [shape: f32[1,128], index: 4, kind: input, shape index: {}]   ;;  %s961_s5 = inlined_call_operand.hbm [shape: bf16[128,128], index: 5, kind: input, shape index: {}]   ;;  %s962_s6 = inlined_call_operand.vmem [shape: f32[1,128], index: 6, kind: input, shape index: {}]   ;;  %s963_s7 = inlined_call_operand.vmem [shape: bf16[128,4], index: 7, kind: input, shape index: {}]   ;;  %s964_s8 = inlined_call_operand.vmem [shape: f32[1,4], index: 8, kind: input, shape index: {}]   ;;  %s965_s9 = inlined_call_operand.vmem [shape: f32[32,4], index: 9, kind: output, shape index: {}]  }
   0x1   :  { %15 = vsyncpa [#allocation5], 0  ;;  %s785_s30 = smov [#allocation4]   ;;  %s715_s13 = scalar_lea.hbm %s957_s1, 256 }
   0x2   :  { %s33_s10 = sshll.u32 %s785_s30, 4  ;;  %p716_p0 = scmp.ne.s32.totalorder %s957_s1, %s715_s13  ;;  %s34_s10 = int_to_ptr.vmem [resolvable:$true] %s33_s10 }
   0x3   :  { %p719_p1 = scmp.lt.u32.totalorder %s715_s13, %s957_s1 }
   0x5   :  { %p721_p2 = pnand %p719_p1, %p716_p0 }
   0x7   :  { %724 = shalt.err (!%p721_p2)
}
   0x8   :  { %s725_s18 = scalar_lea.vmem %s34_s10, 256  ;;  %p730_p4 = scmp.lt.s32.totalorder %s34_s10, %s34_s10 }
   0x9   :  { %p726_p3 = scmp.ne.s32.totalorder %s34_s10, %s725_s18  ;;  %p731_p5 = scmp.lt.s32.totalorder %s725_s18, %s725_s18 }
   0xb   :  { %p732_p6 = por %p731_p5, %p730_p4 }
   0xd   :  { %p733_p7 = pnand %p732_p6, %p726_p3 }
   0xf   :  { %736 = shalt.err (!%p733_p7)
}
  0x10   :  { %s786_s19 = smov 64   ;;  %s787_s20 = smov 4  }
  0x11   :  { %39 = dma.hbm_to_vmem [thread:$0]  %s957_s1, 256, %s34_s10, [#allocation5], %s786_s19, %s786_s19, %s787_s20  }
  0x12   :  { %s788_s23 = smov [#allocation2]   ;;  %s737_s27 = scalar_lea.hbm %s956_s0, 512 }
  0x13   :  { %s21_s24 = sshll.u32 %s788_s23, 4  ;;  %p738_p8 = scmp.ne.s32.totalorder %s956_s0, %s737_s27  ;;  %s22_s24 = int_to_ptr.vmem [resolvable:$true] %s21_s24 }
  0x14   :  { %p741_p9 = scmp.lt.u32.totalorder %s737_s27, %s956_s0 }
  0x16   :  { %p743_p10 = pnand %p741_p9, %p738_p8 }
  0x18   :  { %746 = shalt.err (!%p743_p10)
}
  0x19   :  { %s747_s12 = scalar_lea.vmem %s22_s24, 512  ;;  %p752_p12 = scmp.lt.s32.totalorder %s22_s24, %s22_s24 }
  0x1a   :  { %p748_p11 = scmp.ne.s32.totalorder %s22_s24, %s747_s12  ;;  %p753_p13 = scmp.lt.s32.totalorder %s747_s12, %s747_s12 }
  0x1c   :  { %p754_p0 = por %p753_p13, %p752_p12 }
  0x1e   :  { %p755_p1 = pnand %p754_p0, %p748_p11 }
  0x20   :  { %758 = shalt.err (!%p755_p1)
}
  0x21   :  { %s789_s1 = smov 128   ;;  %s790_s10 = smov 8  }
  0x22   :  { %27 = dma.hbm_to_vmem [thread:$0]  %s956_s0, 512, %s22_s24, [#allocation3], %s789_s1, %s789_s1, %s790_s10  }
  0x23   :  { %s791_s15 = smov [#allocation6]   ;;  %s759_s21 = scalar_lea.hbm %s961_s5, 1024 }
  0x24   :  { %s51_s16 = sshll.u32 %s791_s15, 4  ;;  %p760_p2 = scmp.ne.s32.totalorder %s961_s5, %s759_s21  ;;  %s52_s16 = int_to_ptr.vmem [resolvable:$true] %s51_s16 }
  0x25   :  { %p763_p3 = scmp.lt.u32.totalorder %s759_s21, %s961_s5 }
  0x27   :  { %p765_p4 = pnand %p763_p3, %p760_p2 }
  0x29   :  { %768 = shalt.err (!%p765_p4)
}
  0x2a   :  { %s769_s27 = scalar_lea.vmem %s52_s16, 1024  ;;  %p774_p6 = scmp.lt.s32.totalorder %s52_s16, %s52_s16 }
  0x2b   :  { %p770_p5 = scmp.ne.s32.totalorder %s52_s16, %s769_s27  ;;  %p775_p7 = scmp.lt.s32.totalorder %s769_s27, %s769_s27 }
  0x2d   :  { %p776_p8 = por %p775_p7, %p774_p6 }
  0x2f   :  { %p777_p9 = pnand %p776_p8, %p770_p5 }
  0x31   :  { %780 = shalt.err (!%p777_p9)
}
  0x32   :  { %57 = dma.hbm_to_vmem [thread:$0]  %s961_s5, 1024, %s52_s16, [#allocation5], %s786_s19, %s786_s19, %s787_s20  }
  0x33   :  { %781 = dma.done.wait [#allocation3], 512  }
  0x34   :  { %782 = vsyncadd [#allocation3], 4294966784 }
  0x35   :  { %783 = dma.done.wait [#allocation5], 1280  }
  0x36   :  { %784 = vsyncadd [#allocation5], 4294966016  ;;  %v689_v0 = vld [vmem:[#allocation4] sm:$0xff]   ;;  %v690_v1 = vld [vmem:[#allocation4 + $0x8] sm:$0xff]   ;;  %vm103_vm0 = vcmask 261120   ;;  %vm537_vm1 = vcmask 31744  }
  0x37   :  { %614 = vmatprep.subr.bf16.mxu0 %v689_v0  ;;  %v74_v2 = vld [vmem:[#allocation2] sm:$0xff]  ;;  %v75_v3 = vld [vmem:[#allocation2 + $0x8] sm:$0xff]  ;;  %v76_v4 = vld [vmem:[#allocation2 + $0x10] sm:$0xff] }
  0x38   :  { %615 = vmatpush3.bf16.msra.mxu0 %v689_v0  ;;  %v78_v5 = vpack.c.bf16 %v75_v3, %v74_v2  ;;  %v77_v6 = vld [vmem:[#allocation2 + $0x18] sm:$0xff]  ;;  %v691_v7 = vld [vmem:[%s959_s3] sm:$0xff]   ;;  %v692_v8 = vld [vmem:[%s959_s3 + $0x8] sm:$0xff]  }
  0x39   :  { %616 = vmatprep.subr.bf16.mxu0 %v690_v1  ;;  %v79_v9 = vpack.c.bf16 %v77_v6, %v76_v4  ;;  %622 = vmatprep.subr.bf16.mxu1 %v691_v7  ;;  %v693_v10 = vld [vmem:[%s959_s3 + $0x10] sm:$0xff]   ;;  %v694_v11 = vld [vmem:[%s959_s3 + $0x18] sm:$0xff]   ;;  %v695_v12 = vld [vmem:[%s959_s3 + $0x20] sm:$0xff]  }
  0x3a   :  { %618 = vmatprep.mubr.msk.bf16.mxu0 %vm103_vm0, %v78_v5  ;;  %623 = vmatpush3.bf16.msra.mxu1 %v691_v7  ;;  %v696_v13 = vld [vmem:[%s959_s3 + $0x28] sm:$0xff]   ;;  %v697_v14 = vld [vmem:[%s959_s3 + $0x30] sm:$0xff]   ;;  %v698_v15 = vld [vmem:[%s959_s3 + $0x38] sm:$0xff]  }
  0x3b   :  { %624 = vmatprep.subr.bf16.mxu1 %v692_v8  ;;  %v699_v16 = vld [vmem:[#allocation6] sm:$0xff]   ;;  %v700_v17 = vld [vmem:[#allocation6 + $0x8] sm:$0xff]   ;;  %v701_v18 = vld [vmem:[#allocation6 + $0x10] sm:$0xff]  }
  0x3c   :  { %617 = vmatpush3.bf16.msra.mxu0 %v690_v1  ;;  %v702_v19 = vld [vmem:[#allocation6 + $0x18] sm:$0xff]   ;;  %v703_v20 = vld [vmem:[#allocation6 + $0x20] sm:$0xff]   ;;  %v704_v21 = vld [vmem:[#allocation6 + $0x28] sm:$0xff]  }
  0x3d   :  { %642 = vmatprep.subr.bf16.mxu0 %v699_v16  ;;  %v548_v22 = vld [vmem:[%s958_s2] ss:$0 sm:$0xff]  ;;  %v706_v38 = vld [vmem:[#allocation6 + $0x38] sm:$0xff]   ;;  %v709_v41 = vld [vmem:[%s963_s7 + $0x10] sm:$0xff]  }
  0x3e   :  { %625 = vmatpush3.bf16.msra.mxu1 %v692_v8  ;;  %v705_v37 = vld [vmem:[#allocation6 + $0x30] sm:$0xff]   ;;  %v708_v40 = vld [vmem:[%s963_s7 + $0x8] sm:$0xff]   ;;  %v710_v42 = vld [vmem:[%s963_s7 + $0x18] sm:$0xff]  }
  0x3f   :  { %619 = vmatmul.mubr.msk.bf16.vlgmr.msra.gmra.mrb[0].mxu0 %vm103_vm0, %v79_v9  ;;  %626 = vmatprep.subr.bf16.mxu1 %v693_v10  ;;  %v707_v39 = vld [vmem:[%s963_s7] sm:$0xff]   ;;  %v712_v44 = vld [vmem:[%s963_s7 + $0x28] sm:$0xff]   ;;  %v713_v60 = vld [vmem:[%s963_s7 + $0x30] sm:$0xff]  }
  0x40   :  { %643 = vmatpush3.bf16.msra.mxu0 %v699_v16  ;;  %v711_v43 = vld [vmem:[%s963_s7 + $0x20] sm:$0xff]   ;;  %v714_v61 = vld [vmem:[%s963_s7 + $0x38] sm:$0xff]  }
  0x41   :  { %644 = vmatprep.subr.bf16.mxu0 %v700_v17  ;;  %v553_v45 = vld [vmem:[%s960_s4] ss:$0 sm:$0xff] }
  0x42   :  { %627 = vmatpush3.bf16.msra.mxu1 %v693_v10  ;;  %v562_v62 = vld [vmem:[%s962_s6] ss:$0 sm:$0xff] }
  0x43   :  { %628 = vmatprep.subr.bf16.mxu1 %v694_v11 }
  0x44   :  { %645 = vmatpush3.bf16.msra.mxu0 %v700_v17 }
  0x45   :  { %646 = vmatprep.subr.bf16.mxu0 %v701_v18 }
  0x46   :  { %629 = vmatpush3.bf16.msra.mxu1 %v694_v11 }
  0x47   :  { %630 = vmatprep.subr.bf16.mxu1 %v695_v12 }
  0x48   :  { %647 = vmatpush3.bf16.msra.mxu0 %v701_v18 }
  0x49   :  { %648 = vmatprep.subr.bf16.mxu0 %v702_v19 }
  0x4a   :  { %631 = vmatpush3.bf16.msra.mxu1 %v695_v12 }
  0x4b   :  { %632 = vmatprep.subr.bf16.mxu1 %v696_v13 }
  0x4c   :  { %649 = vmatpush3.bf16.msra.mxu0 %v702_v19 }
  0x4d   :  { %650 = vmatprep.subr.bf16.mxu0 %v703_v20 }
  0x4e   :  { %633 = vmatpush3.bf16.msra.mxu1 %v696_v13  ;;  %v571_v13 = vld [vmem:[%s964_s8] ss:$0 sm:$0xff] }
  0x4f   :  { %634 = vmatprep.subr.bf16.mxu1 %v697_v14 }
  0x50   :  { %651 = vmatpush3.bf16.msra.mxu0 %v703_v20 }
  0x51   :  { %652 = vmatprep.subr.bf16.mxu0 %v704_v21 }
  0x52   :  { %635 = vmatpush3.bf16.msra.mxu1 %v697_v14 }
  0x53   :  { %636 = vmatprep.subr.bf16.mxu1 %v698_v15 }
  0x54   :  { %653 = vmatpush3.bf16.msra.mxu0 %v704_v21 }
  0x55   :  { %654 = vmatprep.subr.bf16.mxu0 %v705_v37 }
  0x56   :  { %637 = vmatpush3.bf16.msra.mxu1 %v698_v15 }
  0x57   :  { %662 = vmatprep.subr.bf16.mxu1 %v707_v39 }
  0x58   :  { %655 = vmatpush3.bf16.msra.mxu0 %v705_v37 }
  0x59   :  { %656 = vmatprep.subr.bf16.mxu0 %v706_v38 }
  0x5c   :  { %657 = vmatpush3.bf16.msra.mxu0 %v706_v38 }
 0x112   :  { %v620_v23 = vpop.f32.mrb[0].mxu0 }
 0x113   :  { %v153_v24 = vadd.f32 %v620_v23, %v548_v22  ;;  %v144_v25 = vpop.f32.mrb[1].mxu0 }
 0x114   :  { %v145_v26 = vadd.f32 %v548_v22, %v144_v25  ;;  %v621_v27 = vpop.f32.mrb[2].mxu0 }
 0x115   :  { %v156_v28 = vadd.f32 %v621_v27, %v548_v22  ;;  %v147_v29 = vpop.f32.mrb[3].mxu0  ;;  %v161_v31 = vmax.f32 %v153_v24, 0.0 }
 0x116   :  { %v148_v30 = vadd.f32 %v548_v22, %v147_v29  ;;  %v159_v33 = vmax.f32 %v145_v26, 0.0 }
 0x117   :  { %v162_v32 = vmax.f32 %v156_v28, 0.0 }
 0x118   :  { %v160_v34 = vmax.f32 %v148_v30, 0.0 }
 0x119   :  { %v164_v35 = vpack.c.bf16 %v162_v32, %v161_v31 }
 0x11a   :  { %v163_v36 = vpack.c.bf16 %v160_v34, %v159_v33 }
 0x11c   :  { %638 = vmatprep.mubr.bf16.mxu1 %v163_v36 }
 0x11d   :  { %639 = vmatmul.mubr.bf16.vlgmr.msra.gmra.mrb[0].mxu1 %v164_v35 }
 0x11e   :  { %663 = vmatpush3.bf16.msra.mxu1 %v707_v39 }
 0x11f   :  { %664 = vmatprep.subr.bf16.mxu1 %v708_v40 }
 0x122   :  { %665 = vmatpush3.bf16.msra.mxu1 %v708_v40 }
 0x123   :  { %666 = vmatprep.subr.bf16.mxu1 %v709_v41 }
 0x126   :  { %667 = vmatpush3.bf16.msra.mxu1 %v709_v41 }
 0x127   :  { %668 = vmatprep.subr.bf16.mxu1 %v710_v42 }
 0x12a   :  { %669 = vmatpush3.bf16.msra.mxu1 %v710_v42 }
 0x12b   :  { %670 = vmatprep.subr.bf16.mxu1 %v711_v43 }
 0x12e   :  { %671 = vmatpush3.bf16.msra.mxu1 %v711_v43 }
 0x12f   :  { %672 = vmatprep.subr.bf16.mxu1 %v712_v44 }
 0x132   :  { %673 = vmatpush3.bf16.msra.mxu1 %v712_v44 }
 0x133   :  { %674 = vmatprep.subr.bf16.mxu1 %v713_v60 }
 0x136   :  { %675 = vmatpush3.bf16.msra.mxu1 %v713_v60 }
 0x137   :  { %676 = vmatprep.subr.bf16.mxu1 %v714_v61 }
 0x13a   :  { %677 = vmatpush3.bf16.msra.mxu1 %v714_v61 }
 0x1f0   :  { %v640_v46 = vpop.f32.mrb[0].mxu1 }
 0x1f1   :  { %v279_v47 = vadd.f32 %v640_v46, %v553_v45  ;;  %v270_v48 = vpop.f32.mrb[1].mxu1 }
 0x1f2   :  { %v271_v49 = vadd.f32 %v553_v45, %v270_v48  ;;  %v641_v50 = vpop.f32.mrb[2].mxu1 }
 0x1f3   :  { %v282_v51 = vadd.f32 %v641_v50, %v553_v45  ;;  %v273_v52 = vpop.f32.mrb[3].mxu1  ;;  %v287_v54 = vmax.f32 %v279_v47, 0.0 }
 0x1f4   :  { %v274_v53 = vadd.f32 %v553_v45, %v273_v52  ;;  %v285_v56 = vmax.f32 %v271_v49, 0.0 }
 0x1f5   :  { %v288_v55 = vmax.f32 %v282_v51, 0.0 }
 0x1f6   :  { %v286_v57 = vmax.f32 %v274_v53, 0.0 }
 0x1f7   :  { %v290_v58 = vpack.c.bf16 %v288_v55, %v287_v54 }
 0x1f8   :  { %v289_v59 = vpack.c.bf16 %v286_v57, %v285_v56 }
 0x1fa   :  { %658 = vmatprep.mubr.bf16.mxu0 %v289_v59 }
 0x1fb   :  { %659 = vmatmul.mubr.bf16.vlgmr.msra.gmra.mrb[4].mxu0 %v290_v58 }
 0x2ce   :  { %v660_v63 = vpop.f32.mrb[4].mxu0 }
 0x2cf   :  { %v405_v0 = vadd.f32 %v660_v63, %v562_v62  ;;  %v396_v1 = vpop.f32.mrb[5].mxu0 }
 0x2d0   :  { %v397_v2 = vadd.f32 %v562_v62, %v396_v1  ;;  %v661_v3 = vpop.f32.mrb[6].mxu0 }
 0x2d1   :  { %v408_v4 = vadd.f32 %v661_v3, %v562_v62  ;;  %v399_v5 = vpop.f32.mrb[7].mxu0  ;;  %v413_v7 = vmax.f32 %v405_v0, 0.0 }
 0x2d2   :  { %v400_v6 = vadd.f32 %v562_v62, %v399_v5  ;;  %v411_v9 = vmax.f32 %v397_v2, 0.0 }
 0x2d3   :  { %v414_v8 = vmax.f32 %v408_v4, 0.0 }
 0x2d4   :  { %v412_v10 = vmax.f32 %v400_v6, 0.0 }
 0x2d5   :  { %v416_v11 = vpack.c.bf16 %v414_v8, %v413_v7 }
 0x2d6   :  { %v415_v12 = vpack.c.bf16 %v412_v10, %v411_v9 }
 0x2d8   :  { %678 = vmatprep.mubr.bf16.mxu1 %v415_v12 }
 0x2d9   :  { %679 = vmatmul.mubr.bf16.vlgmr.msra.gmra.mrb[4].mxu1 %v416_v11 }
 0x3ac   :  { %v680_v14 = vpop.f32.mrb[4].mxu1 }
 0x3ad   :  { %v531_v15 = vadd.f32 %v680_v14, %v571_v13  ;;  %v522_v16 = vpop.f32.mrb[5].mxu1 }
 0x3ae   :  { %v523_v17 = vadd.f32 %v571_v13, %v522_v16  ;;  %v681_v18 = vpop.f32.mrb[6].mxu1 }
 0x3af   :  { %540 = vst.msk [vmem:[%s965_s9 + $0x10] sm:$0xff] %vm537_vm1, %v531_v15  ;;  %v534_v19 = vadd.f32 %v681_v18, %v571_v13  ;;  %v525_v20 = vpop.f32.mrb[7].mxu1 }
 0x3b0   :  { %538 = vst.msk [vmem:[%s965_s9] sm:$0xff] %vm537_vm1, %v523_v17  ;;  %v526_v21 = vadd.f32 %v571_v13, %v525_v20 }
 0x3b1   :  { %541 = vst.msk [vmem:[%s965_s9 + $0x18] sm:$0xff] %vm537_vm1, %v534_v19 }
 0x3b2   :  { %539 = vst.msk [vmem:[%s965_s9 + $0x8] sm:$0xff] %vm537_vm1, %v526_v21 }
 0x3b3   :  { %546 = vsyncpa [#allocation3], 1 }
 0x3b4   :  { %547 = vsyncpa [#allocation5], 1 }

</bundles_post_ra>
